<compile_context>
chip_gen: v6e
topology: v6e:2x2x1
jax: 0.10.0
libtpu: 0.0.40
codegen_flags: <defaults>
</compile_context>

<pallas_src>
import functools

import jax
import jax.numpy as jnp
from jax.experimental import pallas as pl
from jax.experimental.pallas import tpu as pltpu


@functools.lru_cache(maxsize=1)
def _vmem_capacity_bytes():
    try:
        return int(pltpu.get_tpu_info().vmem_capacity_bytes)
    except Exception:
        return 64 << 20          # conservative (v7x-sized) fallback


def _tile_policy():
    """(per-input tile budget, vmem_limit ceiling) chosen per TPU generation."""
    cap = _vmem_capacity_bytes()
    if cap >= (100 << 20):       # v5e / v6e: 128 MiB physical VMEM
        return 12 << 20, 64 << 20
    return 8 << 20, 40 << 20     # v7x: 64 MiB physical VMEM


def _pick_tile_hw(hw, c, itemsize, tile_budget):
    """Lane-aligned spatial tile. Prefers a 128-multiple that divides HW exactly
    (kills the tail mask); keeps each channel's contiguous DMA run >= ~2 KiB."""
    if hw < 256 or hw * c * itemsize <= tile_budget:
        return hw
    lanes_budget = (tile_budget // (c * itemsize)) // 128 * 128
    min_lanes = -(-(2048 // itemsize) // 128) * 128     # 512 f32, 1024 bf16
    lanes = max(128, min_lanes, lanes_budget)
    lanes = min(lanes, (hw // 128) * 128)
    # Snap down to an exact divisor of HW when one exists within 2x of budget.
    lo = max(128, lanes // 2)
    for cand in range(lanes, lo - 1, -128):
        if hw % cand == 0:
            return cand
    return lanes


# ---------------------------------------------------------------------------
# Fused kernel: add + global average pool (tiled over HW, f32 accumulation)
# with the excitation MLP (PReLU + sigmoid) computed in the finalize step.
# Grid: (N, cdiv(HW, tile_hw)); N "parallel", HW "arbitrary".
# ---------------------------------------------------------------------------
def _channel_att_kernel(x_ref, y_ref, wd_ref, bd_ref, alpha_ref, wu_ref, bu_ref,
                        outx_ref, outy_ref, acc_ref, *, hw, tile_hw, c):
    t = pl.program_id(1)
    last = pl.num_programs(1) - 1

    @pl.when(t == 0)
    def _init():
        acc_ref[...] = jnp.zeros_like(acc_ref)

    # Block (1, C, tile_hw) -> (C, tile_hw); accumulate channel sums in f32.
    fusion = x_ref[0].astype(jnp.float32) + y_ref[0].astype(jnp.float32)

    if hw % tile_hw != 0:
        # Only the (padded) final tile needs masking; other steps stay mask-free.
        @pl.when(t != last)
        def _acc_full():
            acc_ref[...] += jnp.sum(fusion, axis=1, keepdims=True)

        @pl.when(t == last)
        def _acc_masked():
            col = jax.lax.broadcasted_iota(jnp.int32, fusion.shape, 1)
            valid = jnp.where(col < (hw - t * tile_hw), fusion, 0.0)
            acc_ref[...] += jnp.sum(valid, axis=1, keepdims=True)
    else:
        acc_ref[...] += jnp.sum(fusion, axis=1, keepdims=True)

    # Excitation MLP, fused into the finalize step.  Channels stay on the
    # sublane axis throughout -> no transposes / lane relayouts.
    @pl.when(t == last)
    def _finalize():
        pooled = acc_ref[...] * (1.0 / hw)                                # (C, 1)
        d = jnp.dot(wd_ref[...], pooled,
                    preferred_element_type=jnp.float32) + bd_ref[...]     # (Cr, 1)
        d = jnp.where(d >= 0.0, d, alpha_ref[...] * d)                    # PReLU
        z = jax.nn.sigmoid(
            jnp.dot(wu_ref[...], d,
                    preferred_element_type=jnp.float32) + bu_ref[...])    # (2C, 1)
        outx_ref[...] = z[:c].reshape(1, c, 1).astype(outx_ref.dtype)
        outy_ref[...] = z[c:].reshape(1, c, 1).astype(outy_ref.dtype)


@jax.jit
def channel_att(x_nchw, y_nchw, params):
    """x_nchw, y_nchw: (N, C, H, W).  Returns [out_x, out_y], each (N, C, 1, 1)."""
    N, C, H, W = x_nchw.shape
    HW = H * W
    Cr = params["w_down"].shape[0]

    # Free reshape of contiguous NCHW -> (N, C, HW); HW sits on the lane axis.
    x = x_nchw.reshape(N, C, HW)
    y = y_nchw.reshape(N, C, HW)

    itemsize = x.dtype.itemsize
    tile_budget, vmem_ceiling = _tile_policy()
    tile_hw = _pick_tile_hw(HW, C, itemsize, tile_budget)
    n_hw = pl.cdiv(HW, tile_hw)

    tile_bytes = C * tile_hw * itemsize
    # 2 inputs x 2 pipeline buffers + headroom for weights/outputs/scratch.
    vmem_limit = int(min(vmem_ceiling, max(16 << 20, 4 * tile_bytes + (4 << 20))))

    feat_spec = pl.BlockSpec((1, C, tile_hw), lambda n, t: (n, 0, t))
    const2 = lambda n, t: (0, 0)   # weights: constant block -> VMEM-resident

    out_x, out_y = pl.pallas_call(
        functools.partial(_channel_att_kernel, hw=HW, tile_hw=tile_hw, c=C),
        out_shape=(jax.ShapeDtypeStruct((N, C, 1), x_nchw.dtype),
                   jax.ShapeDtypeStruct((N, C, 1), x_nchw.dtype)),
        grid_spec=pltpu.PrefetchScalarGridSpec(
            num_scalar_prefetch=0,
            grid=(N, n_hw),
            in_specs=[
                feat_spec, feat_spec,
                pl.BlockSpec((Cr, C), const2),         # w_down  (out, in)
                pl.BlockSpec((Cr, 1), const2),         # b_down
                pl.BlockSpec((1, 1), const2),          # PReLU alpha
                pl.BlockSpec((2 * C, Cr), const2),     # w_up = [up1; up2]
                pl.BlockSpec((2 * C, 1), const2),      # b_up
            ],
            out_specs=(pl.BlockSpec((1, C, 1), lambda n, t: (n, 0, 0)),
                       pl.BlockSpec((1, C, 1), lambda n, t: (n, 0, 0))),
            scratch_shapes=[pltpu.VMEM((C, 1), jnp.float32)],
        ),
        compiler_params=pltpu.CompilerParams(
            dimension_semantics=("parallel", "arbitrary"),
            vmem_limit_bytes=vmem_limit),
    )(x, y, params["w_down"], params["b_down"], params["alpha"],
      params["w_up"], params["b_up"])

    # (N, C, 1) -> (N, C, 1, 1) to match the PyTorch NCHW output.
    return [out_x.reshape(N, C, 1, 1), out_y.reshape(N, C, 1, 1)]


def reference(x_nchw, y_nchw, params):
    """Pure-JAX reference matching the PyTorch forward."""
    fusion = x_nchw + y_nchw
    pooled = jnp.mean(fusion, axis=(2, 3))                            # (N, C)
    d = pooled @ params["w_down"].T + params["b_down"][:, 0]          # (N, Cr)
    a = params["alpha"][0, 0]
    d = jnp.where(d >= 0, d, a * d)
    z = jax.nn.sigmoid(d @ params["w_up"].T + params["b_up"][:, 0])   # (N, 2C)
    N, C = pooled.shape
    return [z[:, :C].reshape(N, C, 1, 1), z[:, C:].reshape(N, C, 1, 1)]


def init_params(key, channel, reduction=8):
    cr = channel // reduction
    ks = jax.random.split(key, 6)
    sd = 1.0 / jnp.sqrt(channel)
    su = 1.0 / jnp.sqrt(cr)
    w_up1 = jax.random.normal(ks[2], (channel, cr), jnp.float32) * su
    w_up2 = jax.random.normal(ks[3], (channel, cr), jnp.float32) * su
    b_up1 = jax.random.normal(ks[4], (channel, 1), jnp.float32) * su
    b_up2 = jax.random.normal(ks[5], (channel, 1), jnp.float32) * su
    return {
        # Conv2d 1x1 weights kept in PyTorch (out, in) layout (squeezed).
        "w_down": jax.random.normal(ks[0], (cr, channel), jnp.float32) * sd,
        "b_down": jax.random.normal(ks[1], (cr, 1), jnp.float32) * sd,
        "alpha": jnp.full((1, 1), 0.25, jnp.float32),     # PReLU default init
        # up1 / up2 pre-fused once at init (hoisted out of the per-call path).
        "w_up": jnp.concatenate([w_up1, w_up2], axis=0),  # (2C, Cr)
        "b_up": jnp.concatenate([b_up1, b_up2], axis=0),  # (2C, 1)
    }


if __name__ == "__main__":
    N, C, H, W = 2, 32, 16, 16      # channel=32, reduction=8 -> C/r=4
    key = jax.random.PRNGKey(0)
    kx, ky, kp = jax.random.split(key, 3)
    x = jax.random.normal(kx, (N, C, H, W), jnp.float32)
    y = jax.random.normal(ky, (N, C, H, W), jnp.float32)
    params = init_params(kp, C, reduction=8)

    out_x, out_y = channel_att(x, y, params)
    jax.block_until_ready(out_x)
    jax.block_until_ready(out_y)

    ref_x, ref_y = reference(x, y, params)
    assert out_x.shape == (N, C, 1, 1) and out_y.shape == (N, C, 1, 1)
    assert jnp.allclose(out_x, ref_x, atol=1e-5, rtol=1e-5)
    assert jnp.allclose(out_y, ref_y, atol=1e-5, rtol=1e-5)

    print("KERNEL_OK")
</pallas_src>

<mosaic_0001>
module attributes {stable_mosaic.version = 11 : i64} {
  func.func @_channel_att_kernel(%arg0: i32, %arg1: i32, %arg2: memref<1x32x256xf32, #tpu.memory_space<vmem>>, %arg3: memref<1x32x256xf32, #tpu.memory_space<vmem>>, %arg4: memref<4x32xf32, #tpu.memory_space<vmem>>, %arg5: memref<4x1xf32, #tpu.memory_space<vmem>>, %arg6: memref<1x1xf32, #tpu.memory_space<vmem>>, %arg7: memref<64x4xf32, #tpu.memory_space<vmem>>, %arg8: memref<64x1xf32, #tpu.memory_space<vmem>>, %arg9: memref<1x32x1xf32, #tpu.memory_space<vmem>>, %arg10: memref<1x32x1xf32, #tpu.memory_space<vmem>>, %arg11: memref<32x1xf32, #tpu.memory_space<vmem>>) attributes {dimension_semantics = [#tpu.dimension_semantics<parallel>, #tpu.dimension_semantics<arbitrary>], iteration_bounds = array<i64: 2, 1>, scalar_prefetch = 0 : i64, scratch_operands = 1 : i64, tpu.core_type = #tpu.core_type<tc>, window_params = [{transform_indices = @transform_0, window_bounds = array<i64: 1, 32, 256>}, {transform_indices = @transform_1, window_bounds = array<i64: 1, 32, 256>}, {pipeline_mode = #tpu.pipeline_mode<synchronous>, transform_indices = @transform_2, window_bounds = array<i64: 4, 32>}, {pipeline_mode = #tpu.pipeline_mode<synchronous>, transform_indices = @transform_3, window_bounds = array<i64: 4, 1>}, {pipeline_mode = #tpu.pipeline_mode<synchronous>, transform_indices = @transform_4, window_bounds = array<i64: 1, 1>}, {pipeline_mode = #tpu.pipeline_mode<synchronous>, transform_indices = @transform_5, window_bounds = array<i64: 64, 4>}, {pipeline_mode = #tpu.pipeline_mode<synchronous>, transform_indices = @transform_6, window_bounds = array<i64: 64, 1>}, {transform_indices = @transform_7, window_bounds = array<i64: 1, 32, 1>}, {transform_indices = @transform_8, window_bounds = array<i64: 1, 32, 1>}]} {
    %c0_i32 = arith.constant 0 : i32
    %0 = arith.cmpi eq, %arg1, %c0_i32 : i32
    %1 = arith.extui %0 : i1 to i32
    %c0_i32_0 = arith.constant 0 : i32
    %2 = arith.cmpi ne, %1, %c0_i32_0 : i32
    scf.if %2 {
      %cst_12 = arith.constant 0.000000e+00 : f32
      %16 = vector.broadcast %cst_12 : f32 to vector<32x1xf32>
      %c0_13 = arith.constant 0 : index
      %c0_14 = arith.constant 0 : index
      %17 = vector.load %arg11[%c0_13, %c0_14] : memref<32x1xf32, #tpu.memory_space<vmem>>, vector<32x1xf32>
      tpu.vector_store %arg11[%c0_13, %c0_14], %16 {strides = array<i32>} : memref<32x1xf32, #tpu.memory_space<vmem>>, vector<32x1xf32>,
    } else {
    }
    %c0 = arith.constant 0 : index
    %c0_1 = arith.constant 0 : index
    %c0_2 = arith.constant 0 : index
    %3 = vector.load %arg2[%c0, %c0_1, %c0_2] : memref<1x32x256xf32, #tpu.memory_space<vmem>>, vector<1x32x256xf32>
    %4 = vector.shape_cast %3 : vector<1x32x256xf32> to vector<32x256xf32>
    %c0_3 = arith.constant 0 : index
    %c0_4 = arith.constant 0 : index
    %c0_5 = arith.constant 0 : index
    %5 = vector.load %arg3[%c0_3, %c0_4, %c0_5] : memref<1x32x256xf32, #tpu.memory_space<vmem>>, vector<1x32x256xf32>
    %6 = vector.shape_cast %5 : vector<1x32x256xf32> to vector<32x256xf32>
    %7 = arith.addf %4, %6 : vector<32x256xf32>
    %c0_6 = arith.constant 0 : index
    %c0_7 = arith.constant 0 : index
    %8 = vector.load %arg11[%c0_6, %c0_7] : memref<32x1xf32, #tpu.memory_space<vmem>>, vector<32x1xf32>
    %cst = arith.constant dense<0.000000e+00> : vector<32xf32>
    %9 = vector.multi_reduction <add>, %7, %cst [1] : vector<32x256xf32> to vector<32xf32>
    %10 = vector.shape_cast %9 : vector<32xf32> to vector<32x1xf32>
    %11 = arith.addf %8, %10 : vector<32x1xf32>
    %c0_8 = arith.constant 0 : index
    %c0_9 = arith.constant 0 : index
    %12 = vector.load %arg11[%c0_8, %c0_9] : memref<32x1xf32, #tpu.memory_space<vmem>>, vector<32x1xf32>
    tpu.vector_store %arg11[%c0_8, %c0_9], %11 {strides = array<i32>} : memref<32x1xf32, #tpu.memory_space<vmem>>, vector<32x1xf32>,
    %c0_i32_10 = arith.constant 0 : i32
    %13 = arith.cmpi eq, %arg1, %c0_i32_10 : i32
    %14 = arith.extui %13 : i1 to i32
    %c0_i32_11 = arith.constant 0 : i32
    %15 = arith.cmpi ne, %14, %c0_i32_11 : i32
    scf.if %15 {
      %c0_12 = arith.constant 0 : index
      %c0_13 = arith.constant 0 : index
      %16 = vector.load %arg11[%c0_12, %c0_13] : memref<32x1xf32, #tpu.memory_space<vmem>>, vector<32x1xf32>
      %cst_14 = arith.constant 3.906250e-03 : f32
      %17 = vector.broadcast %cst_14 : f32 to vector<32x1xf32>
      %18 = arith.mulf %16, %17 : vector<32x1xf32>
      %c0_15 = arith.constant 0 : index
      %c0_16 = arith.constant 0 : index
      %19 = vector.load %arg4[%c0_15, %c0_16] : memref<4x32xf32, #tpu.memory_space<vmem>>, vector<4x32xf32>
      %cst_17 = arith.constant dense<0.000000e+00> : vector<4x1xf32>
      %20 = tpu.matmul %19, %18, %cst_17 {dimension_numbers = #tpu.dot_dimension_numbers<[1], [0], [0], [1], [0, 0, 1, 1], [], []>} : vector<4x32xf32>, vector<32x1xf32>, vector<4x1xf32> -> vector<4x1xf32>
      %c0_18 = arith.constant 0 : index
      %c0_19 = arith.constant 0 : index
      %21 = vector.load %arg5[%c0_18, %c0_19] : memref<4x1xf32, #tpu.memory_space<vmem>>, vector<4x1xf32>
      %22 = arith.addf %20, %21 : vector<4x1xf32>
      %cst_20 = arith.constant 0.000000e+00 : f32
      %23 = vector.broadcast %cst_20 : f32 to vector<4x1xf32>
      %24 = arith.cmpf oge, %22, %23 : vector<4x1xf32>
      %c0_21 = arith.constant 0 : index
      %c0_22 = arith.constant 0 : index
      %25 = vector.load %arg6[%c0_21, %c0_22] : memref<1x1xf32, #tpu.memory_space<vmem>>, vector<1x1xf32>
      %26 = vector.broadcast %25 : vector<1x1xf32> to vector<4x1xf32>
      %27 = arith.mulf %26, %22 : vector<4x1xf32>
      %28 = arith.select %24, %22, %27 : vector<4x1xi1>, vector<4x1xf32>
      %c0_23 = arith.constant 0 : index
      %c0_24 = arith.constant 0 : index
      %29 = vector.load %arg7[%c0_23, %c0_24] : memref<64x4xf32, #tpu.memory_space<vmem>>, vector<64x4xf32>
      %cst_25 = arith.constant dense<0.000000e+00> : vector<64x1xf32>
      %30 = tpu.matmul %29, %28, %cst_25 {dimension_numbers = #tpu.dot_dimension_numbers<[1], [0], [0], [1], [0, 0, 1, 1], [], []>} : vector<64x4xf32>, vector<4x1xf32>, vector<64x1xf32> -> vector<64x1xf32>
      %c0_26 = arith.constant 0 : index
      %c0_27 = arith.constant 0 : index
      %31 = vector.load %arg8[%c0_26, %c0_27] : memref<64x1xf32, #tpu.memory_space<vmem>>, vector<64x1xf32>
      %32 = arith.addf %30, %31 : vector<64x1xf32>
      %33 = arith.negf %32 : vector<64x1xf32>
      %34 = math.exp %33 : vector<64x1xf32>
      %cst_28 = arith.constant 1.000000e+00 : f32
      %35 = vector.broadcast %cst_28 : f32 to vector<64x1xf32>
      %36 = arith.addf %35, %34 : vector<64x1xf32>
      %37 = arith.divf %35, %36 : vector<64x1xf32>
      %38 = vector.extract_strided_slice %37 {offsets = [0, 0], sizes = [32, 1], strides = [1, 1]} : vector<64x1xf32> to vector<32x1xf32>
      %39 = vector.shape_cast %38 : vector<32x1xf32> to vector<1x32x1xf32>
      %c0_29 = arith.constant 0 : index
      %c0_30 = arith.constant 0 : index
      %c0_31 = arith.constant 0 : index
      %40 = vector.load %arg9[%c0_29, %c0_30, %c0_31] : memref<1x32x1xf32, #tpu.memory_space<vmem>>, vector<1x32x1xf32>
      tpu.vector_store %arg9[%c0_29, %c0_30, %c0_31], %39 {strides = array<i32>} : memref<1x32x1xf32, #tpu.memory_space<vmem>>, vector<1x32x1xf32>,
      %41 = vector.extract_strided_slice %37 {offsets = [32, 0], sizes = [32, 1], strides = [1, 1]} : vector<64x1xf32> to vector<32x1xf32>
      %42 = vector.shape_cast %41 : vector<32x1xf32> to vector<1x32x1xf32>
      %c0_32 = arith.constant 0 : index
      %c0_33 = arith.constant 0 : index
      %c0_34 = arith.constant 0 : index
      %43 = vector.load %arg10[%c0_32, %c0_33, %c0_34] : memref<1x32x1xf32, #tpu.memory_space<vmem>>, vector<1x32x1xf32>
      tpu.vector_store %arg10[%c0_32, %c0_33, %c0_34], %42 {strides = array<i32>} : memref<1x32x1xf32, #tpu.memory_space<vmem>>, vector<1x32x1xf32>,
    } else {
    }
    return
  }
  func.func @transform_0(%arg0: i32, %arg1: i32) -> (i32, i32, i32) {
    %c0_i32 = arith.constant 0 : i32
    %c0_i32_0 = arith.constant 0 : i32
    return %arg0, %c0_i32, %arg1 : i32, i32, i32
  }
  func.func @transform_1(%arg0: i32, %arg1: i32) -> (i32, i32, i32) {
    %c0_i32 = arith.constant 0 : i32
    %c0_i32_0 = arith.constant 0 : i32
    return %arg0, %c0_i32, %arg1 : i32, i32, i32
  }
  func.func @transform_2(%arg0: i32, %arg1: i32) -> (i32, i32) {
    %c0_i32 = arith.constant 0 : i32
    %c0_i32_0 = arith.constant 0 : i32
    %c0_i32_1 = arith.constant 0 : i32
    return %c0_i32, %c0_i32_0 : i32, i32
  }
  func.func @transform_3(%arg0: i32, %arg1: i32) -> (i32, i32) {
    %c0_i32 = arith.constant 0 : i32
    %c0_i32_0 = arith.constant 0 : i32
    %c0_i32_1 = arith.constant 0 : i32
    return %c0_i32, %c0_i32_0 : i32, i32
  }
  func.func @transform_4(%arg0: i32, %arg1: i32) -> (i32, i32) {
    %c0_i32 = arith.constant 0 : i32
    %c0_i32_0 = arith.constant 0 : i32
    %c0_i32_1 = arith.constant 0 : i32
    return %c0_i32, %c0_i32_0 : i32, i32
  }
  func.func @transform_5(%arg0: i32, %arg1: i32) -> (i32, i32) {
    %c0_i32 = arith.constant 0 : i32
    %c0_i32_0 = arith.constant 0 : i32
    %c0_i32_1 = arith.constant 0 : i32
    return %c0_i32, %c0_i32_0 : i32, i32
  }
  func.func @transform_6(%arg0: i32, %arg1: i32) -> (i32, i32) {
    %c0_i32 = arith.constant 0 : i32
    %c0_i32_0 = arith.constant 0 : i32
    %c0_i32_1 = arith.constant 0 : i32
    return %c0_i32, %c0_i32_0 : i32, i32
  }
  func.func @transform_7(%arg0: i32, %arg1: i32) -> (i32, i32, i32) {
    %c0_i32 = arith.constant 0 : i32
    %c0_i32_0 = arith.constant 0 : i32
    %c0_i32_1 = arith.constant 0 : i32
    return %arg0, %c0_i32, %c0_i32_0 : i32, i32, i32
  }
  func.func @transform_8(%arg0: i32, %arg1: i32) -> (i32, i32, i32) {
    %c0_i32 = arith.constant 0 : i32
    %c0_i32_0 = arith.constant 0 : i32
    %c0_i32_1 = arith.constant 0 : i32
    return %arg0, %c0_i32, %c0_i32_0 : i32, i32, i32
  }
}

</mosaic_0001>

<bundles_post_ra>
// kernel: channel_att.1
= control target key start
LH: loop header
LB: loop body
LE: loop exit
PB: predicated region body
PF: predicated region fallthrough
CT: control target
= control target key end

     0   :  { %s1075_s29 = smov 0   ;;  %s1077_s30 = smov 0   ;;  %s1205_s0 = inlined_call_operand.vmem [shape: f32[2,32,256], index: 0, kind: input, shape index: {}]   ;;  %s1206_s1 = inlined_call_operand.vmem [shape: f32[2,32,256], index: 1, kind: input, shape index: {}]   ;;  %s1207_s2 = inlined_call_operand.vmem [shape: f32[4,32], index: 2, kind: input, shape index: {}]   ;;  %s1208_s3 = inlined_call_operand.vmem [shape: f32[4,1], index: 3, kind: input, shape index: {}]   ;;  %s1209_s4 = inlined_call_operand.<no memory space> [shape: f32[1,1], index: 4, kind: input, shape index: {}]   ;;  %s1210_s5 = inlined_call_operand.vmem [shape: f32[64,4], index: 5, kind: input, shape index: {}]   ;;  %s1211_s6 = inlined_call_operand.vmem [shape: f32[64,1], index: 6, kind: input, shape index: {}]   ;;  %s1212_s7 = inlined_call_operand.vmem [shape: f32[2,32,1], index: 7, kind: output, shape index: {0}]   ;;  %s1213_s8 = inlined_call_operand.vmem [shape: f32[2,32,1], index: 8, kind: output, shape index: {1}]  }
   0x1   :  { %v14_v0 = vstv %s1209_s4  ;;  %s1079_s9 = smov 0  }
   0x2   :  { %15 = vst [vmem:[#allocation3] sm:$0x1] %v14_v0 }
   0x3 LB: > { %s33_s4 = sadd.s32 1, %s1019_s30  ;;  %p870_p0 = scmp.ge.s32.totalorder %s1023_s9, 1  ;;  %s1023_s9 = sphi %s1079_s9, %s21_s9   ;;  %s1019_s30 = sphi %s1077_s30, %s1215_s30   ;;  %s1015_s29 = sphi %s1075_s29, %s1214_s29  }
   0x4   : > { %p35_p1 = scmp.ge.s32.totalorder %s33_s4, 2  ;;  %p303_p2 = scmp.lt.s32.totalorder %s1023_s9, 3 }
   0x6   : > { %s1217_s4 = smov (%p35_p1, %s33_s4), 0  ;;  %p304_p3 = pnand %p870_p0, %p303_p2 }
   0x7   : > { %p356_p4 = scmp.lt.s32.totalorder (!%p304_p3), %s1015_s29, 1 }
   0x8   : > { %307 = sbr.rel (%p304_p3) target bundleno = 623 (0x26f), region = 48 }
   0xd   : > { %vm389_vm0 = vcmask 7168   ;;  %v1025_v1 = vmov 0.0   ;;  %s1219_s29 = smov (!%p356_p4, %s1015_s29), 1  ;;  %vm1026_vm1 = vmmov 0   ;;  %v454_v50 = vld [vmem:[%s1207_s2] sm:$0xf] }
   0xe   : > { %393 = vst.msk [vmem:[#allocation2 + $0x18] sm:$0xff] %vm389_vm0, %v1025_v1  ;;  %390 = vst.msk [vmem:[#allocation2] sm:$0xff] %vm389_vm0, %v1025_v1  ;;  %918 = vmatprep.subr.mxu0 %v1025_v1  ;;  %s900_s10 = sshll.u32 %s1219_s29, 6  ;;  %926 = vmatprep.mubr.msk.f32.mxu0 %vm1026_vm1, %v1025_v1  ;;  %vm456_vm2 = vcmask 261120   ;;  %v540_v51 = vld [vmem:[%s1210_s5] sm:$0xff]  ;;  %vm556_vm3 = vcmask 31744  }
   0xf   : > { %391 = vst.msk [vmem:[#allocation2 + $0x8] sm:$0xff] %vm389_vm0, %v1025_v1  ;;  %392 = vst.msk [vmem:[#allocation2 + $0x10] sm:$0xff] %vm389_vm0, %v1025_v1  ;;  %s363_s13 = scalar_lea.vmem %s1205_s0, %s900_s10  ;;  %s373_s16 = scalar_lea.vmem %s1206_s1, %s900_s10  ;;  %931 = vmatprep.mubr.msk.f32.mxu1 %vm556_vm3, %v540_v51  ;;  %v455_v52 = vld [vmem:[%s1208_s3] sm:$0xf]  ;;  %vm581_vm5 = vcmask 1043456   ;;  %v541_v59 = vld [vmem:[%s1210_s5 + $0x8] sm:$0xff] }
  0x10   : > { %v400_v2 = vld [vmem:[%s363_s13 + $0x30] sm:$0xff]  ;;  %v401_v3 = vld [vmem:[%s363_s13 + $0x38] sm:$0xff]  ;;  %v398_v7 = vld [vmem:[%s363_s13 + $0x20] sm:$0xff]  ;;  %s902_s15 = sshll.u32 %s1219_s29, 5 }
  0x11   : > { %v408_v4 = vld [vmem:[%s373_s16 + $0x30] sm:$0xff]  ;;  %v409_v5 = vld [vmem:[%s373_s16 + $0x38] sm:$0xff]  ;;  %v399_v8 = vld [vmem:[%s363_s13 + $0x28] sm:$0xff]  ;;  %s379_s18 = scalar_lea.vmem %s1212_s7, %s902_s15  ;;  %s384_s20 = scalar_lea.vmem %s1213_s8, %s902_s15 }
  0x12   : > { %v416_v6 = vadd.f32 %v408_v4, %v400_v2  ;;  %v417_v9 = vadd.f32 %v409_v5, %v401_v3  ;;  %v406_v10 = vld [vmem:[%s373_s16 + $0x20] sm:$0xff]  ;;  %v407_v11 = vld [vmem:[%s373_s16 + $0x28] sm:$0xff]  ;;  %v396_v12 = vld [vmem:[%s363_s13 + $0x10] sm:$0xff] }
  0x13   : > { %v414_v13 = vadd.f32 %v406_v10, %v398_v7  ;;  %v415_v14 = vadd.f32 %v407_v11, %v399_v8  ;;  %v397_v15 = vld [vmem:[%s363_s13 + $0x18] sm:$0xff]  ;;  %v404_v16 = vld [vmem:[%s373_s16 + $0x10] sm:$0xff]  ;;  %v394_v21 = vld [vmem:[%s363_s13] sm:$0xff] }
  0x14   : > { %v405_v17 = vld [vmem:[%s373_s16 + $0x18] sm:$0xff]  ;;  %v431_v18 = vadd.f32 %v417_v9, %v416_v6  ;;  %v412_v19 = vadd.f32 %v404_v16, %v396_v12  ;;  %v395_v22 = vld [vmem:[%s363_s13 + $0x8] sm:$0xff]  ;;  %v402_v23 = vld [vmem:[%s373_s16] sm:$0xff] }
  0x15   : > { %v413_v20 = vadd.f32 %v405_v17, %v397_v15  ;;  %v403_v24 = vld [vmem:[%s373_s16 + $0x8] sm:$0xff]  ;;  %v410_v25 = vadd.f32 %v402_v23, %v394_v21  ;;  %v428_v26 = vadd.f32 %v415_v14, %v414_v13  ;;  %v421_v30 = vld [vmem:[#allocation2 + $0x18] sm:$0xff]  ;;  %v418_v38 = vld [vmem:[#allocation2] sm:$0xff] }
  0x16   : > { %432 = vadd.xlane.f32.xlu0 %v431_v18  ;;  %v411_v28 = vadd.f32 %v403_v24, %v395_v22  ;;  %v419_v32 = vld [vmem:[#allocation2 + $0x8] sm:$0xff]  ;;  %v420_v34 = vld [vmem:[#allocation2 + $0x10] sm:$0xff]  ;;  %v880_v54 = vld [vmem:[#allocation3] ss:$0 sm:$0xff] }
  0x17   : > { %v425_v27 = vadd.f32 %v413_v20, %v412_v19  ;;  %v542_v60 = vld [vmem:[%s1210_s5 + $0x10] sm:$0xff]  ;;  %v543_v61 = vld [vmem:[%s1210_s5 + $0x18] sm:$0xff]  ;;  %v544_v62 = vld [vmem:[%s1210_s5 + $0x20] sm:$0xff] }
  0x18   : > { %v422_v29 = vadd.f32 %v411_v28, %v410_v25  ;;  %v545_v63 = vld [vmem:[%s1210_s5 + $0x28] sm:$0xff]  ;;  %v546_v0 = vld [vmem:[%s1210_s5 + $0x30] sm:$0xff]  ;;  %v548_v4 = vld [vmem:[%s1211_s6] sm:$0xff] }
  0x19   : > { %426 = vadd.xlane.f32.xlu1 %v425_v27  ;;  %v549_v2 = vld [vmem:[%s1211_s6 + $0x8] sm:$0xff]  ;;  %v551_v7 = vld [vmem:[%s1211_s6 + $0x18] sm:$0xff]  ;;  %v550_v11 = vld [vmem:[%s1211_s6 + $0x10] sm:$0xff] }
  0x1a   : > { %429 = vadd.xlane.f32.xlu0 %v428_v26  ;;  %v553_v15 = vld [vmem:[%s1211_s6 + $0x28] sm:$0xff]  ;;  %v552_v19 = vld [vmem:[%s1211_s6 + $0x20] sm:$0xff]  ;;  %v555_v23 = vld [vmem:[%s1211_s6 + $0x38] sm:$0xff] }
  0x1b   : > { %v554_v27 = vld [vmem:[%s1211_s6 + $0x30] sm:$0xff] }
  0x1d   : > { %423 = vadd.xlane.f32.xlu1 %v422_v29 }
  0x9f   : > { %v433_v31 = vpop.xlane.xlu0 %432 }
  0xa0   : > { %v437_v33 = vadd.f32 %v433_v31, %v421_v30 }
  0xa2   : > { %v427_v35 = vpop.xlane.xlu1 %426  ;;  %442 = vst.msk [vmem:[#allocation2 + $0x18] sm:$0xff] %vm389_vm0, %v437_v33 }
  0xa3   : > { %v435_v36 = vadd.f32 %v427_v35, %v419_v32  ;;  %v430_v37 = vpop.xlane.xlu0 %429 }
  0xa4   : > { %v436_v39 = vadd.f32 %v430_v37, %v420_v34 }
  0xa5   : > { %440 = vst.msk [vmem:[#allocation2 + $0x8] sm:$0xff] %vm389_vm0, %v435_v36 }
  0xa6   : > { %v424_v40 = vpop.xlane.xlu1 %423  ;;  %441 = vst.msk [vmem:[#allocation2 + $0x10] sm:$0xff] %vm389_vm0, %v436_v39 }
  0xa7   : > { %v434_v41 = vadd.f32 %v424_v40, %v418_v38 }
  0xa9   : > { %439 = vst.msk [vmem:[#allocation2] sm:$0xff] %vm389_vm0, %v434_v41  ;;  %v449_v42 = vld [vmem:[#allocation2 + $0x18] sm:$0xff] }
  0xaa   : > { %v453_v43 = vmul.f32 0.00390625, %v449_v42 }
  0xac   : > { %919 = vmatpush3.msra.mxu0 %v453_v43  ;;  %v447_v45 = vld [vmem:[#allocation2 + $0x8] sm:$0xff] }
  0xad   : > { %920 = vmatprep.subr.mxu0 %v1025_v1  ;;  %v448_v44 = vld [vmem:[#allocation2 + $0x10] sm:$0xff]  ;;  %v451_v48 = vmul.f32 0.00390625, %v447_v45 }
  0xae   : > { %v452_v46 = vmul.f32 0.00390625, %v448_v44 }
  0xb0   : > { %v446_v47 = vld [vmem:[#allocation2] sm:$0xff]  ;;  %921 = vmatpush3.msra.mxu0 %v452_v46 }
  0xb1   : > { %v450_v49 = vmul.f32 0.00390625, %v446_v47  ;;  %922 = vmatprep.subr.mxu0 %v1025_v1 }
  0xb2   : > { %923 = vmatpush3.msra.mxu0 %v451_v48 }
  0xb3   : > { %924 = vmatprep.subr.mxu0 %v1025_v1  ;;  %v547_v1 = vld [vmem:[%s1210_s5 + $0x38] sm:$0xff] }
  0xb4   : > { %925 = vmatpush3.msra.mxu0 %v450_v49 }
  0xb5   : > { %927 = vmatmul.mubr.msk.f32.vlgmr.msra.gmra.mxu0 %vm456_vm2, %v454_v50 }
 0x175   : > { %v526_v53 = vpop.f32.mrf.mxu0 }
 0x176   : > { %v527_v55 = vadd.f32 %v526_v53, %v455_v52 }
 0x177   : > { %v928_v56 = vpop.f32.mrf.mxu0 }
 0x178   : > { %vm530_vm4 = vcmp.ge.f32.partialorder %v527_v55, 0.0  ;;  %v538_v57 = vmul.f32 %v880_v54, %v527_v55 }
 0x17a   : > { %v539_v58 = vsel %vm530_vm4, %v527_v55, %v538_v57 }
 0x17b   : > { %929 = vmatprep.subr.msk.mxu1 %vm581_vm5, %v539_v58 }
 0x17c   : > { %930 = vmatpush3.msk.msra.mxu1 %vm581_vm5, %v539_v58 }
 0x17d   : > { %932 = vmatmul.mubr.msk.f32.vlgmr.msra.gmra.mxu1 %vm556_vm3, %v541_v59 }
 0x17e   : > { %934 = vmatprep.mubr.msk.f32.mxu1 %vm556_vm3, %v542_v60 }
 0x181   : > { %935 = vmatmul.mubr.msk.f32.gmra.mxu1 %vm556_vm3, %v543_v61 }
 0x182   : > { %937 = vmatprep.mubr.msk.f32.mxu1 %vm556_vm3, %v544_v62 }
 0x185   : > { %938 = vmatmul.mubr.msk.f32.gmra.mxu1 %vm556_vm3, %v545_v63 }
 0x186   : > { %940 = vmatprep.mubr.msk.f32.mxu1 %vm556_vm3, %v546_v0 }
 0x189   : > { %941 = vmatmul.mubr.msk.f32.gmra.mxu1 %vm556_vm3, %v547_v1 }
 0x23d   : > { %v933_v3 = vpop.f32.mrf.mxu1 }
 0x23e   : > { %v657_v5 = vadd.f32 %v933_v3, %v549_v2 }
 0x23f   : > { %v651_v6 = vpop.f32.mrf.mxu1 }
 0x240   : > { %v891_v8 = vmul.f32 -1.442695, %v657_v5  ;;  %v652_v9 = vadd.f32 %v651_v6, %v548_v4 }
 0x241   : > { %v936_v10 = vpop.f32.mrf.mxu1 }
 0x242   : > { %969 = vpow2.f32 %v891_v8  ;;  %v890_v12 = vmul.f32 -1.442695, %v652_v9  ;;  %v667_v13 = vadd.f32 %v936_v10, %v551_v7 }
 0x243   : > { %v661_v14 = vpop.f32.mrf.mxu1 }
 0x244   : > { %971 = vpow2.f32 %v890_v12  ;;  %v893_v16 = vmul.f32 -1.442695, %v667_v13  ;;  %v662_v17 = vadd.f32 %v661_v14, %v550_v11 }
 0x245   : > { %v939_v18 = vpop.f32.mrf.mxu1 }
 0x246   : > { %973 = vpow2.f32 %v893_v16  ;;  %v892_v20 = vmul.f32 -1.442695, %v662_v17  ;;  %v677_v21 = vadd.f32 %v939_v18, %v553_v15 }
 0x247   : > { %v671_v22 = vpop.f32.mrf.mxu1 }
 0x248   : > { %975 = vpow2.f32 %v892_v20  ;;  %v895_v24 = vmul.f32 -1.442695, %v677_v21  ;;  %v672_v25 = vadd.f32 %v671_v22, %v552_v19 }
 0x249   : > { %v942_v26 = vpop.f32.mrf.mxu1 }
 0x24a   : > { %977 = vpow2.f32 %v895_v24  ;;  %v894_v28 = vmul.f32 -1.442695, %v672_v25  ;;  %v687_v29 = vadd.f32 %v942_v26, %v555_v23 }
 0x24b   : > { %v681_v30 = vpop.f32.mrf.mxu1 }
 0x24c   : > { %979 = vpow2.f32 %v894_v28  ;;  %v897_v31 = vmul.f32 -1.442695, %v687_v29  ;;  %v682_v32 = vadd.f32 %v681_v30, %v554_v27 }
 0x24e   : > { %981 = vpow2.f32 %v897_v31  ;;  %v896_v33 = vmul.f32 -1.442695, %v682_v32 }
 0x24f   : > { %v970_v34 = vpop.eup %969 }
 0x250   : > { %v715_v35 = vadd.f32 1.0, %v970_v34  ;;  %983 = vpow2.f32 %v896_v33 }
 0x251   : > { %v972_v36 = vpop.eup %971 }
 0x252   : > { %985 = vrcp.f32 %v715_v35  ;;  %v714_v37 = vadd.f32 1.0, %v972_v36 }
 0x253   : > { %v974_v38 = vpop.eup %973 }
 0x254   : > { %987 = vrcp.f32 %v714_v37  ;;  %v717_v39 = vadd.f32 1.0, %v974_v38 }
 0x255   : > { %v976_v40 = vpop.eup %975 }
 0x256   : > { %989 = vrcp.f32 %v717_v39  ;;  %v716_v41 = vadd.f32 1.0, %v976_v40 }
 0x257   : > { %v978_v42 = vpop.eup %977 }
 0x258   : > { %991 = vrcp.f32 %v716_v41  ;;  %v719_v43 = vadd.f32 1.0, %v978_v42 }
 0x259   : > { %v980_v44 = vpop.eup %979 }
 0x25a   : > { %993 = vrcp.f32 %v719_v43  ;;  %v718_v45 = vadd.f32 1.0, %v980_v44 }
 0x25b   : > { %v982_v46 = vpop.eup %981 }
 0x25c   : > { %995 = vrcp.f32 %v718_v45  ;;  %v721_v47 = vadd.f32 1.0, %v982_v46 }
 0x25d   : > { %v984_v48 = vpop.eup %983 }
 0x25e   : > { %997 = vrcp.f32 %v721_v47  ;;  %v720_v49 = vadd.f32 1.0, %v984_v48 }
 0x25f   : > { %v986_v50 = vpop.eup %985 }
 0x260   : > { %739 = vst.msk [vmem:[%s379_s18 + $0x8] sm:$0xff] %vm389_vm0, %v986_v50  ;;  %999 = vrcp.f32 %v720_v49 }
 0x261   : > { %v988_v51 = vpop.eup %987 }
 0x262   : > { %738 = vst.msk [vmem:[%s379_s18] sm:$0xff] %vm389_vm0, %v988_v51 }
 0x263   : > { %v990_v52 = vpop.eup %989 }
 0x264   : > { %741 = vst.msk [vmem:[%s379_s18 + $0x18] sm:$0xff] %vm389_vm0, %v990_v52 }
 0x265   : > { %v992_v53 = vpop.eup %991 }
 0x266   : > { %740 = vst.msk [vmem:[%s379_s18 + $0x10] sm:$0xff] %vm389_vm0, %v992_v53 }
 0x267   : > { %v994_v54 = vpop.eup %993 }
 0x268   : > { %743 = vst.msk [vmem:[%s384_s20 + $0x8] sm:$0xff] %vm389_vm0, %v994_v54 }
 0x269   : > { %v996_v55 = vpop.eup %995 }
 0x26a   : > { %742 = vst.msk [vmem:[%s384_s20] sm:$0xff] %vm389_vm0, %v996_v55 }
 0x26b   : > { %v998_v56 = vpop.eup %997 }
 0x26c   : > { %745 = vst.msk [vmem:[%s384_s20 + $0x18] sm:$0xff] %vm389_vm0, %v998_v56 }
 0x26d   : > { %v1000_v57 = vpop.eup %999 }
 0x26e   : > { %744 = vst.msk [vmem:[%s384_s20 + $0x10] sm:$0xff] %vm389_vm0, %v1000_v57 }
 0x26f PF: > { %s21_s9 = sadd.s32 1, %s1023_s9   ;;  %s1214_s29 = smov %s1019_s30 }
 0x270   : > { %p18_p5 = scmp.ge.s32.totalorder %s21_s9, 4   ;;  %s1215_s30 = smov %s1217_s4 }
 0x272   :  { %20 = sbr.rel (!%p18_p5) target bundleno = 3 (0x3), region = 101 }

</bundles_post_ra>
